<compile_context>
chip_gen: v7x
topology: tpu7x:2x2x1
jax: 0.10.0
libtpu: 0.0.40
codegen_flags: <defaults>
</compile_context>

<pallas_src>
import functools

import jax
import jax.numpy as jnp
from jax.experimental import pallas as pl
from jax.experimental.pallas import tpu as pltpu

NUM_ATTN = 64     # matches `num_attn` in the PyTorch code
LANES = 128       # TPU lane width
SUBLANES = 8      # TPU sublane count (f32)


def _round_up(x, m):
    return ((x + m - 1) // m) * m


def attn_classifier_kernel(x_ref, w1_ref, b1_ref, w2_ref, b2_ref, wc_ref, bc_ref,
                           logits_ref, attn_ref, *, seq_len):
    # x_ref: (TB, S8, H) batch tile (S8 = sequence length padded to 8).
    TB, S8, H = x_ref.shape

    x = x_ref[...]                                   # (TB, S8, H) f32

    # (TB, S8, H) -> (TB*S8, H) is layout-preserving because S8 % 8 == 0
    # (wrapper pads the sequence axis), so no VMEM relayout copy is made.
    x2d = x.reshape(TB * S8, H)

    # --- Attn MLP: Linear(H -> 128-lane-padded 64) on the MXU, ReLU on VPU ---
    h = jnp.dot(x2d, w1_ref[...], preferred_element_type=jnp.float32) + b1_ref[...]
    h = jnp.maximum(h, 0.0)                          # (TB*S8, 128), full-lane vregs

    # --- Linear(64 -> 1) as VPU multiply + lane reduce (a degenerate N=1 MXU
    #     matmul would waste >99% of the MXU and force a relayout).  The padded
    #     w2 lanes are zero, so they contribute nothing. ---
    scores = jnp.sum(h * w2_ref[...], axis=-1, keepdims=True) + b2_ref[...]  # (TB*S8, 1)
    # Splitting the leading dim keeps the column (sublane) layout -> free.
    scores = scores.reshape(TB, S8, 1)

    # Mask padded sequence rows out of the softmax (only when S was padded).
    if S8 != seq_len:
        pos = jax.lax.broadcasted_iota(jnp.int32, (TB, S8, 1), 1)
        scores = jnp.where(pos < seq_len, scores, -jnp.inf)

    # --- softmax over the sequence axis (dim=1), max-stabilized ---
    m = jnp.max(scores, axis=1, keepdims=True)       # (TB, 1, 1)
    e = jnp.exp(scores - m)                          # (TB, S8, 1)
    # Exact reciprocal: only TB reciprocals per step, so approx=True buys
    # nothing measurable here and exact keeps the 1e-5 accuracy target.
    attn = e * pl.reciprocal(jnp.sum(e, axis=1, keepdims=True), approx=False)

    # --- attention-weighted sum over S: VPU broadcast-multiply + sublane
    #     reduce, reusing x already resident in vregs (no MXU, no relayout) ---
    feats = jnp.sum(x * attn, axis=1)                # (TB, H)

    # --- classifier head (lane dim pre-padded to a multiple of 128 so the
    #     logits store is a full, unmasked vst) ---
    logits_ref[...] = (
        jnp.dot(feats, wc_ref[...], preferred_element_type=jnp.float32) + bc_ref[...]
    )

    # attn output in (TB, S8) lane layout; this tiny relayout + store is off
    # the x-stream critical path (attn is H-times smaller than the x tile).
    attn_ref[...] = attn.reshape(TB, S8)


def _vmem_capacity_bytes():
    """Physical VMEM of the local TPU generation (fallback: v7x's 64 MiB)."""
    try:
        cap = int(pltpu.get_tpu_info().vmem_capacity_bytes)
        if cap > 0:
            return cap
    except Exception:
        pass
    return 64 << 20


def _pick_batch_tile(B, per_row_bytes, fixed_bytes, vmem_limit):
    """Largest sublane-aligned batch tile whose pipeline footprint fits VMEM.

    Keeps the grid >= 2 steps whenever the batch allows it so the "parallel"
    batch axis can actually be sharded across both v7x TensorCores.
    Returns (tile, padded_batch).
    """
    budget = vmem_limit - fixed_bytes - (2 << 20)            # 2 MiB headroom
    cap = max(SUBLANES, budget // max(per_row_bytes, 1))
    if B <= SUBLANES:
        return B, B                                          # one full-extent tile
    half = -(-B // 2)                                        # ceil(B / 2)
    tb = min(cap, max(SUBLANES, half))
    tb = max(SUBLANES, (tb // SUBLANES) * SUBLANES)          # partial tiles: multiple of 8
    b_pad = -(-B // tb) * tb                                 # pad B to a tile multiple
    return tb, b_pad


def attn_classifier_forward(x, params):
    """x: (B, S, H) float32. Returns (logits (B, C), attns (B, S, 1))."""
    B, S, H = x.shape
    C = params["wc"].shape[1]

    NA_PAD = _round_up(NUM_ATTN, LANES)      # full-lane vregs for h / the scorer
    Cp = _round_up(C, LANES)                 # lane-dense logits store
    S8 = _round_up(S, SUBLANES)              # makes the (TB*S8, H) reshape free

    # --- one-time weight prep (tiny; runs once per call outside the kernel) ---
    w1 = jnp.pad(params["w1"], ((0, 0), (0, NA_PAD - NUM_ATTN)))
    b1 = jnp.pad(params["b1"], ((0, 0), (0, NA_PAD - NUM_ATTN)))
    w2_row = jnp.pad(params["w2"].reshape(1, NUM_ATTN), ((0, 0), (0, NA_PAD - NUM_ATTN)))
    b2 = params["b2"]
    wc = jnp.pad(params["wc"], ((0, 0), (0, Cp - C)))
    bc = jnp.pad(params["bc"], ((0, 0), (0, Cp - C)))

    # --- generation-aware VMEM budget & batch tiling ---
    vmem_cap = _vmem_capacity_bytes()                            # 128 MiB v5e/v6e, 64 MiB v7x
    vmem_limit = max(min(3 * vmem_cap // 4, 96 << 20), 32 << 20)
    # Resident weights/biases are double-buffered by the default pipeline.
    fixed = 4 * 2 * (_round_up(H, SUBLANES) * NA_PAD            # w1
                     + 2 * SUBLANES * NA_PAD                    # b1, w2 row
                     + SUBLANES * LANES                         # b2
                     + _round_up(H, SUBLANES) * Cp              # wc
                     + SUBLANES * Cp)                           # bc
    # Per batch row: x double-buffer + h + x*attn product + feats + out blocks.
    per_row = 4 * (2 * S8 * H + S8 * NA_PAD + S8 * H + H
                   + 2 * Cp + 2 * _round_up(S8, LANES))
    TB, B_pad = _pick_batch_tile(B, per_row, fixed, vmem_limit)

    xp = x
    if B_pad != B or S8 != S:
        xp = jnp.pad(x, ((0, B_pad - B), (0, S8 - S), (0, 0)))

    grid = (B_pad // TB,)
    const2d = lambda b: (0, 0)   # weights: same block every step (stay resident)

    cost = pl.CostEstimate(
        flops=(2 * B_pad * S8 * H * NA_PAD       # Linear(H -> 64, lane padded)
               + 2 * B_pad * S8 * NA_PAD         # 64 -> 1 scorer
               + 2 * B_pad * S8 * H              # attention-weighted sum
               + 2 * B_pad * H * Cp),            # classifier head
        transcendentals=B_pad * S8,              # exp in softmax
        bytes_accessed=4 * (B_pad * S8 * H + H * NA_PAD + H * Cp
                            + B_pad * Cp + B_pad * S8),
    )

    logits_padded, attn = pl.pallas_call(
        functools.partial(attn_classifier_kernel, seq_len=S),
        grid=grid,
        out_shape=(
            jax.ShapeDtypeStruct((B_pad, Cp), jnp.float32),
            jax.ShapeDtypeStruct((B_pad, S8), jnp.float32),
        ),
        in_specs=[
            pl.BlockSpec((TB, S8, H), lambda b: (b, 0, 0)),      # x tile (pipelined)
            pl.BlockSpec((H, NA_PAD), const2d),                  # w1 (lane-padded)
            pl.BlockSpec((1, NA_PAD), const2d),                  # b1
            pl.BlockSpec((1, NA_PAD), const2d),                  # w2 (row, lane-padded)
            pl.BlockSpec((1, 1), const2d),                       # b2
            pl.BlockSpec((H, Cp), const2d),                      # wc (lane-padded)
            pl.BlockSpec((1, Cp), const2d),                      # bc (lane-padded)
        ],
        out_specs=(
            pl.BlockSpec((TB, Cp), lambda b: (b, 0)),            # logits tile
            pl.BlockSpec((TB, S8), lambda b: (b, 0)),            # attn tile
        ),
        compiler_params=pltpu.CompilerParams(
            dimension_semantics=("parallel",),     # megacore batch sharding (v7x)
            vmem_limit_bytes=int(vmem_limit),
        ),
        cost_estimate=cost,
    )(xp, w1, b1, w2_row, b2, wc, bc)

    logits = logits_padded[:B, :C]
    # match PyTorch: F.softmax(...).unsqueeze(2) -> (B, S, 1)
    attns = attn[:B, :S].reshape(B, S, 1)
    return logits, attns


def init_params(key, h_dim, c_num):
    """Deterministic parameter init (shapes from AttnClassifier.__init__)."""
    k1, k2, k3, k4, k5, k6 = jax.random.split(key, 6)
    scale = 0.1
    return {
        # Attn.main[0]: Linear(h_dim, num_attn)   (stored as (in, out))
        "w1": (scale * jax.random.normal(k1, (h_dim, NUM_ATTN))).astype(jnp.float32),
        "b1": (scale * jax.random.normal(k2, (1, NUM_ATTN))).astype(jnp.float32),
        # Attn.main[2]: Linear(num_attn, 1)
        "w2": (scale * jax.random.normal(k3, (NUM_ATTN, 1))).astype(jnp.float32),
        "b2": (scale * jax.random.normal(k4, (1, 1))).astype(jnp.float32),
        # AttnClassifier.main: Linear(h_dim, c_num)
        "wc": (scale * jax.random.normal(k5, (h_dim, c_num))).astype(jnp.float32),
        "bc": (scale * jax.random.normal(k6, (1, c_num))).astype(jnp.float32),
    }


def reference_forward(x, params):
    """Pure-JAX reference matching the PyTorch forward semantics."""
    B, S, H = x.shape
    tmp = x.reshape(-1, H)
    h = jnp.maximum(tmp @ params["w1"] + params["b1"], 0.0)
    scores = (h @ params["w2"] + params["b2"]).reshape(B, S)
    attn = jax.nn.softmax(scores, axis=1)[:, :, None]          # (B, S, 1)
    feats = (x * attn).sum(axis=1)                              # (B, H)
    logits = feats @ params["wc"] + params["bc"]                # (B, C)
    return logits, attn


if __name__ == "__main__":
    B, S, H, C = 2, 8, 32, 4   # batch, seq, hidden (h_dim), classes (c_num)

    key = jax.random.PRNGKey(0)
    kx, kp = jax.random.split(key)
    x = jax.random.normal(kx, (B, S, H), dtype=jnp.float32)
    params = init_params(kp, H, C)

    logits, attns = attn_classifier_forward(x, params)
    jax.block_until_ready((logits, attns))

    ref_logits, ref_attns = reference_forward(x, params)
    assert logits.shape == (B, C) and attns.shape == (B, S, 1)
    assert jnp.allclose(logits, ref_logits, atol=1e-5, rtol=1e-5)
    assert jnp.allclose(attns, ref_attns, atol=1e-5, rtol=1e-5)

    print("KERNEL_OK")
</pallas_src>

<mosaic_0001>
module attributes {stable_mosaic.version = 11 : i64} {
  func.func @attn_classifier_kernel(%arg0: i32, %arg1: memref<2x8x32xf32, #tpu.memory_space<vmem>>, %arg2: memref<32x128xf32, #tpu.memory_space<vmem>>, %arg3: memref<1x128xf32, #tpu.memory_space<vmem>>, %arg4: memref<1x128xf32, #tpu.memory_space<vmem>>, %arg5: memref<1x1xf32, #tpu.memory_space<vmem>>, %arg6: memref<32x128xf32, #tpu.memory_space<vmem>>, %arg7: memref<1x128xf32, #tpu.memory_space<vmem>>, %arg8: memref<2x128xf32, #tpu.memory_space<vmem>>, %arg9: memref<2x8xf32, #tpu.memory_space<vmem>>) attributes {dimension_semantics = [#tpu.dimension_semantics<parallel>], iteration_bounds = array<i64: 1>, scalar_prefetch = 0 : i64, scratch_operands = 0 : i64, tpu.core_type = #tpu.core_type<tc>, window_params = [{transform_indices = @transform_0, window_bounds = array<i64: 2, 8, 32>}, {pipeline_mode = #tpu.pipeline_mode<synchronous>, transform_indices = @transform_1, window_bounds = array<i64: 32, 128>}, {pipeline_mode = #tpu.pipeline_mode<synchronous>, transform_indices = @transform_2, window_bounds = array<i64: 1, 128>}, {pipeline_mode = #tpu.pipeline_mode<synchronous>, transform_indices = @transform_3, window_bounds = array<i64: 1, 128>}, {pipeline_mode = #tpu.pipeline_mode<synchronous>, transform_indices = @transform_4, window_bounds = array<i64: 1, 1>}, {pipeline_mode = #tpu.pipeline_mode<synchronous>, transform_indices = @transform_5, window_bounds = array<i64: 32, 128>}, {pipeline_mode = #tpu.pipeline_mode<synchronous>, transform_indices = @transform_6, window_bounds = array<i64: 1, 128>}, {transform_indices = @transform_7, window_bounds = array<i64: 2, 128>}, {transform_indices = @transform_8, window_bounds = array<i64: 2, 8>}]} {
    %c0 = arith.constant 0 : index
    %c0_0 = arith.constant 0 : index
    %c0_1 = arith.constant 0 : index
    %0 = vector.load %arg1[%c0, %c0_0, %c0_1] : memref<2x8x32xf32, #tpu.memory_space<vmem>>, vector<2x8x32xf32>
    %1 = vector.shape_cast %0 : vector<2x8x32xf32> to vector<16x32xf32>
    %c0_2 = arith.constant 0 : index
    %c0_3 = arith.constant 0 : index
    %2 = vector.load %arg2[%c0_2, %c0_3] : memref<32x128xf32, #tpu.memory_space<vmem>>, vector<32x128xf32>
    %cst = arith.constant dense<0.000000e+00> : vector<16x128xf32>
    %3 = tpu.matmul %1, %2, %cst {dimension_numbers = #tpu.dot_dimension_numbers<[1], [0], [0], [1], [0, 0, 1, 1], [], []>} : vector<16x32xf32>, vector<32x128xf32>, vector<16x128xf32> -> vector<16x128xf32>
    %c0_4 = arith.constant 0 : index
    %c0_5 = arith.constant 0 : index
    %4 = vector.load %arg3[%c0_4, %c0_5] : memref<1x128xf32, #tpu.memory_space<vmem>>, vector<1x128xf32>
    %5 = vector.broadcast %4 : vector<1x128xf32> to vector<16x128xf32>
    %6 = arith.addf %3, %5 : vector<16x128xf32>
    %cst_6 = arith.constant 0.000000e+00 : f32
    %7 = vector.broadcast %cst_6 : f32 to vector<16x128xf32>
    %8 = arith.maximumf %6, %7 : vector<16x128xf32>
    %c0_7 = arith.constant 0 : index
    %c0_8 = arith.constant 0 : index
    %9 = vector.load %arg4[%c0_7, %c0_8] : memref<1x128xf32, #tpu.memory_space<vmem>>, vector<1x128xf32>
    %10 = vector.broadcast %9 : vector<1x128xf32> to vector<16x128xf32>
    %11 = arith.mulf %8, %10 : vector<16x128xf32>
    %cst_9 = arith.constant dense<0.000000e+00> : vector<16xf32>
    %12 = vector.multi_reduction <add>, %11, %cst_9 [1] : vector<16x128xf32> to vector<16xf32>
    %13 = vector.shape_cast %12 : vector<16xf32> to vector<16x1xf32>
    %c0_10 = arith.constant 0 : index
    %c0_11 = arith.constant 0 : index
    %14 = vector.load %arg5[%c0_10, %c0_11] : memref<1x1xf32, #tpu.memory_space<vmem>>, vector<1x1xf32>
    %15 = vector.broadcast %14 : vector<1x1xf32> to vector<16x1xf32>
    %16 = arith.addf %13, %15 : vector<16x1xf32>
    %17 = vector.shape_cast %16 : vector<16x1xf32> to vector<2x8x1xf32>
    %cst_12 = arith.constant dense<0xFF800000> : vector<2x1xf32>
    %18 = vector.multi_reduction <maximumf>, %17, %cst_12 [1] : vector<2x8x1xf32> to vector<2x1xf32>
    %19 = vector.shape_cast %18 : vector<2x1xf32> to vector<2x1x1xf32>
    %20 = vector.broadcast %19 : vector<2x1x1xf32> to vector<2x8x1xf32>
    %21 = arith.subf %17, %20 : vector<2x8x1xf32>
    %22 = math.exp %21 : vector<2x8x1xf32>
    %cst_13 = arith.constant dense<0.000000e+00> : vector<2x1xf32>
    %23 = vector.multi_reduction <add>, %22, %cst_13 [1] : vector<2x8x1xf32> to vector<2x1xf32>
    %24 = vector.shape_cast %23 : vector<2x1xf32> to vector<2x1x1xf32>
    %25 = tpu.reciprocal %24 : vector<2x1x1xf32> -> vector<2x1x1xf32>
    %26 = vector.broadcast %25 : vector<2x1x1xf32> to vector<2x8x1xf32>
    %27 = arith.mulf %22, %26 : vector<2x8x1xf32>
    %28 = vector.broadcast %27 : vector<2x8x1xf32> to vector<2x8x32xf32>
    %29 = arith.mulf %0, %28 : vector<2x8x32xf32>
    %cst_14 = arith.constant dense<0.000000e+00> : vector<2x32xf32>
    %30 = vector.multi_reduction <add>, %29, %cst_14 [1] : vector<2x8x32xf32> to vector<2x32xf32>
    %c0_15 = arith.constant 0 : index
    %c0_16 = arith.constant 0 : index
    %31 = vector.load %arg6[%c0_15, %c0_16] : memref<32x128xf32, #tpu.memory_space<vmem>>, vector<32x128xf32>
    %cst_17 = arith.constant dense<0.000000e+00> : vector<2x128xf32>
    %32 = tpu.matmul %30, %31, %cst_17 {dimension_numbers = #tpu.dot_dimension_numbers<[1], [0], [0], [1], [0, 0, 1, 1], [], []>} : vector<2x32xf32>, vector<32x128xf32>, vector<2x128xf32> -> vector<2x128xf32>
    %c0_18 = arith.constant 0 : index
    %c0_19 = arith.constant 0 : index
    %33 = vector.load %arg7[%c0_18, %c0_19] : memref<1x128xf32, #tpu.memory_space<vmem>>, vector<1x128xf32>
    %34 = vector.broadcast %33 : vector<1x128xf32> to vector<2x128xf32>
    %35 = arith.addf %32, %34 : vector<2x128xf32>
    %c0_20 = arith.constant 0 : index
    %c0_21 = arith.constant 0 : index
    %36 = vector.load %arg8[%c0_20, %c0_21] : memref<2x128xf32, #tpu.memory_space<vmem>>, vector<2x128xf32>
    tpu.vector_store %arg8[%c0_20, %c0_21], %35 {strides = array<i32>} : memref<2x128xf32, #tpu.memory_space<vmem>>, vector<2x128xf32>,
    %37 = vector.shape_cast %27 : vector<2x8x1xf32> to vector<2x8xf32>
    %c0_22 = arith.constant 0 : index
    %c0_23 = arith.constant 0 : index
    %38 = vector.load %arg9[%c0_22, %c0_23] : memref<2x8xf32, #tpu.memory_space<vmem>>, vector<2x8xf32>
    tpu.vector_store %arg9[%c0_22, %c0_23], %37 {strides = array<i32>} : memref<2x8xf32, #tpu.memory_space<vmem>>, vector<2x8xf32>,
    return
  }
  func.func @transform_0(%arg0: i32) -> (i32, i32, i32) {
    %c0_i32 = arith.constant 0 : i32
    %c0_i32_0 = arith.constant 0 : i32
    %c0_i32_1 = arith.constant 0 : i32
    return %arg0, %c0_i32, %c0_i32_0 : i32, i32, i32
  }
  func.func @transform_1(%arg0: i32) -> (i32, i32) {
    %c0_i32 = arith.constant 0 : i32
    %c0_i32_0 = arith.constant 0 : i32
    %c0_i32_1 = arith.constant 0 : i32
    return %c0_i32, %c0_i32_0 : i32, i32
  }
  func.func @transform_2(%arg0: i32) -> (i32, i32) {
    %c0_i32 = arith.constant 0 : i32
    %c0_i32_0 = arith.constant 0 : i32
    %c0_i32_1 = arith.constant 0 : i32
    return %c0_i32, %c0_i32_0 : i32, i32
  }
  func.func @transform_3(%arg0: i32) -> (i32, i32) {
    %c0_i32 = arith.constant 0 : i32
    %c0_i32_0 = arith.constant 0 : i32
    %c0_i32_1 = arith.constant 0 : i32
    return %c0_i32, %c0_i32_0 : i32, i32
  }
  func.func @transform_4(%arg0: i32) -> (i32, i32) {
    %c0_i32 = arith.constant 0 : i32
    %c0_i32_0 = arith.constant 0 : i32
    %c0_i32_1 = arith.constant 0 : i32
    return %c0_i32, %c0_i32_0 : i32, i32
  }
  func.func @transform_5(%arg0: i32) -> (i32, i32) {
    %c0_i32 = arith.constant 0 : i32
    %c0_i32_0 = arith.constant 0 : i32
    %c0_i32_1 = arith.constant 0 : i32
    return %c0_i32, %c0_i32_0 : i32, i32
  }
  func.func @transform_6(%arg0: i32) -> (i32, i32) {
    %c0_i32 = arith.constant 0 : i32
    %c0_i32_0 = arith.constant 0 : i32
    %c0_i32_1 = arith.constant 0 : i32
    return %c0_i32, %c0_i32_0 : i32, i32
  }
  func.func @transform_7(%arg0: i32) -> (i32, i32) {
    %c0_i32 = arith.constant 0 : i32
    %c0_i32_0 = arith.constant 0 : i32
    return %arg0, %c0_i32 : i32, i32
  }
  func.func @transform_8(%arg0: i32) -> (i32, i32) {
    %c0_i32 = arith.constant 0 : i32
    %c0_i32_0 = arith.constant 0 : i32
    return %arg0, %c0_i32 : i32, i32
  }
}

</mosaic_0001>

<bundles_post_ra>
// kernel: tpu_custom_call.1
= control target key start
LH: loop header
LB: loop body
LE: loop exit
PB: predicated region body
PF: predicated region fallthrough
CT: control target
= control target key end

     0   :  { %s745_s0 = inlined_call_operand.hbm [shape: f32[2,8,32], index: 0, kind: input, shape index: {}]   ;;  %s746_s1 = inlined_call_operand.hbm [shape: f32[32,128], index: 1, kind: input, shape index: {}]   ;;  %s747_s2 = inlined_call_operand.vmem [shape: f32[1,128], index: 2, kind: input, shape index: {}]   ;;  %s748_s3 = inlined_call_operand.vmem [shape: f32[1,128], index: 3, kind: input, shape index: {}]   ;;  %s749_s4 = inlined_call_operand.<no memory space> [shape: f32[1,1], index: 4, kind: input, shape index: {}]   ;;  %s750_s5 = inlined_call_operand.hbm [shape: f32[32,128], index: 5, kind: input, shape index: {}]   ;;  %s751_s6 = inlined_call_operand.vmem [shape: f32[1,128], index: 6, kind: input, shape index: {}]   ;;  %s752_s7 = inlined_call_operand.hbm [shape: f32[2,128], index: 7, kind: output, shape index: {0}]   ;;  %s753_s8 = inlined_call_operand.hbm [shape: f32[2,8], index: 8, kind: output, shape index: {1}]  }
   0x1   :  { %v14_v0 = vstv %s749_s4 }
   0x2   :  { %15 = vst [vmem:[#allocation2] sm:$0x1] %v14_v0 }
   0x3   :  { %16 = vsyncpa [#allocation4], 0 }
   0x4   :  { %17 = vsyncpa [#allocation7], 0 }
   0x5   :  { %18 = vsyncpa [#allocation5], 0 }
   0x6   :  { %19 = vsyncpa [#allocation11], 0  ;;  %s582_s29 = smov [#allocation6]   ;;  %s583_s9 = smov [#allocation3]  }
   0x7   :  { %s37_s30 = sshll.u32 %s582_s29, 4  ;;  %s25_s10 = sshll.u32 %s583_s9, 4  ;;  %s38_s30 = int_to_ptr.vmem [resolvable:$true] %s37_s30  ;;  %s641_s10 = int_to_ptr.vmem [resolvable:$true] %s25_s10 }
   0x8   :  { %s464_s13 = scalar_lea.hbm %s746_s1, 512 }
   0x9   :  { %p465_p0 = scmp.ne.s32.totalorder %s746_s1, %s464_s13  ;;  %p468_p1 = scmp.lt.u32.totalorder %s464_s13, %s746_s1 }
   0xb   :  { %p470_p2 = pnand %p468_p1, %p465_p0 }
   0xd   :  { %473 = shalt.err (!%p470_p2)
}
   0xe   :  { %s474_s17 = scalar_lea.vmem %s38_s30, 512  ;;  %p479_p4 = scmp.lt.s32.totalorder %s38_s30, %s38_s30 }
   0xf   :  { %p475_p3 = scmp.ne.s32.totalorder %s38_s30, %s474_s17  ;;  %p480_p5 = scmp.lt.s32.totalorder %s474_s17, %s474_s17 }
  0x11   :  { %p481_p6 = por %p480_p5, %p479_p4 }
  0x13   :  { %p482_p7 = pnand %p481_p6, %p475_p3 }
  0x15   :  { %485 = shalt.err (!%p482_p7)
}
  0x16   :  { %s584_s18 = smov 128   ;;  %s585_s19 = smov 8  }
  0x17   :  { %43 = dma.hbm_to_vmem [thread:$0]  %s746_s1, 512, %s38_s30, [#allocation7], %s584_s18, %s584_s18, %s585_s19  }
  0x18   :  { %s486_s24 = scalar_lea.hbm %s745_s0, 256 }
  0x19   :  { %p487_p8 = scmp.ne.s32.totalorder %s745_s0, %s486_s24  ;;  %p490_p9 = scmp.lt.u32.totalorder %s486_s24, %s745_s0 }
  0x1b   :  { %p492_p10 = pnand %p490_p9, %p487_p8 }
  0x1d   :  { %495 = shalt.err (!%p492_p10)
}
  0x1e   :  { %s496_s29 = scalar_lea.vmem %s641_s10, 256  ;;  %p501_p12 = scmp.lt.s32.totalorder %s641_s10, %s641_s10 }
  0x1f   :  { %p497_p11 = scmp.ne.s32.totalorder %s641_s10, %s496_s29  ;;  %p502_p13 = scmp.lt.s32.totalorder %s496_s29, %s496_s29 }
  0x21   :  { %p503_p0 = por %p502_p13, %p501_p12 }
  0x23   :  { %p504_p1 = pnand %p503_p0, %p497_p11 }
  0x25   :  { %507 = shalt.err (!%p504_p1)
}
  0x26   :  { %31 = dma.hbm_to_vmem [thread:$0]  %s745_s0, 256, %s641_s10, [#allocation4], %s584_s18, %s584_s18, %s585_s19  }
  0x27   :  { %s586_s9 = smov [#allocation8]   ;;  %s508_s14 = scalar_lea.hbm %s750_s5, 512 }
  0x28   :  { %s55_s11 = sshll.u32 %s586_s9, 4  ;;  %p509_p2 = scmp.ne.s32.totalorder %s750_s5, %s508_s14  ;;  %s56_s11 = int_to_ptr.vmem [resolvable:$true] %s55_s11 }
  0x29   :  { %p512_p3 = scmp.lt.u32.totalorder %s508_s14, %s750_s5 }
  0x2b   :  { %p514_p4 = pnand %p512_p3, %p509_p2 }
  0x2d   :  { %517 = shalt.err (!%p514_p4)
}
  0x2e   :  { %s518_s20 = scalar_lea.vmem %s56_s11, 512  ;;  %p523_p6 = scmp.lt.s32.totalorder %s56_s11, %s56_s11 }
  0x2f   :  { %p519_p5 = scmp.ne.s32.totalorder %s56_s11, %s518_s20  ;;  %p524_p7 = scmp.lt.s32.totalorder %s518_s20, %s518_s20 }
  0x31   :  { %p525_p8 = por %p524_p7, %p523_p6 }
  0x33   :  { %p526_p9 = pnand %p525_p8, %p519_p5 }
  0x35   :  { %529 = shalt.err (!%p526_p9)
}
  0x36   :  { %61 = dma.hbm_to_vmem [thread:$0]  %s750_s5, 512, %s56_s11, [#allocation7], %s584_s18, %s584_s18, %s585_s19  }
  0x37   :  { %574 = dma.done.wait [#allocation4], 256  }
  0x38   :  { %575 = vsyncadd [#allocation4], 4294967040 }
  0x39   :  { %576 = dma.done.wait [#allocation7], 1024  }
  0x3a   :  { %577 = vsyncadd [#allocation7], 4294966272  ;;  %vm86_vm0 = vcmask 261120   ;;  %v75_v1 = vld [vmem:[#allocation6] sm:$0xff]  ;;  %v76_v2 = vld [vmem:[#allocation6 + $0x8] sm:$0xff]  ;;  %v587_v19 = vmov 0  }
  0x3b   :  { %v77_v3 = vld [vmem:[#allocation6 + $0x10] sm:$0xff]  ;;  %v429_v4 = vpack.c.bf16 %v76_v2, %v75_v1  ;;  %v78_v5 = vld [vmem:[#allocation6 + $0x18] sm:$0xff]  ;;  %v389_v9 = vld [vmem:[%s747_s2] ss:$0 sm:$0xff]  ;;  %454 = vset.pattern.permute.xlu1 %v587_v19  ;;  %455 = vset.pattern.permute.xlu0 %v587_v19  ;;  %vm192_vm1 = vcmask 7168   ;;  %v588_v2 = vmov 0.0|0.0  }
  0x3c   :  { %v693_v6 = vld [vmem:[#allocation3] sm:$0xff]  ;;  %v433_v7 = vpack.c.bf16 %v78_v5, %v77_v3  ;;  %v697_v8 = vld [vmem:[#allocation3 + $0x8] sm:$0xff]  ;;  %v392_v14 = vld [vmem:[%s748_s3] ss:$0 sm:$0xff]  ;;  %437 = vmatprep.subr.bf16.mxu1 %v588_v2  ;;  %vm589_vm2 = vmmov 0   ;;  %vm270_vm3 = vcmask 1041409  }
  0x3d   :  { %415 = vmatprep.mubr.msk.f32.mxu0 %vm86_vm0, %v693_v6  ;;  %430 = vmatprep.subr.bf16.mxu0 %v429_v4  ;;  %v393_v20 = vld [vmem:[#allocation2] ss:$0 sm:$0xff]  ;;  %v257_v63 = vld [vmem:[#allocation8] sm:$0xff]  ;;  %v259_v3 = vld [vmem:[#allocation8 + $0x10] sm:$0xff]  ;;  %vm357_vm4 = vcmask 58368   ;;  %s591_s2 = smov [#allocation10]  }
  0x3e   :  { %432 = vmatpush3.bf16.msra.mxu0 %v429_v4  ;;  %v258_v0 = vld [vmem:[#allocation8 + $0x8] sm:$0xff]  ;;  %v260_v4 = vld [vmem:[#allocation8 + $0x18] sm:$0xff]  ;;  %s375_s3 = sshll.u32 %s591_s2, 4  ;;  %s376_s3 = int_to_ptr.vmem [resolvable:$true] %s375_s3 }
  0x3f   :  { %434 = vmatprep.subr.bf16.mxu0 %v433_v7  ;;  %v438_v1 = vpack.c.bf16 %v258_v0, %v257_v63  ;;  %v441_v5 = vpack.c.bf16 %v260_v4, %v259_v3  ;;  %s530_s22 = scalar_lea.vmem %s376_s3, 32  ;;  %p535_p11 = scmp.lt.s32.totalorder %s376_s3, %s376_s3 }
  0x40   :  { %p531_p10 = scmp.ne.s32.totalorder %s376_s3, %s530_s22  ;;  %p536_p12 = scmp.lt.s32.totalorder %s530_s22, %s530_s22 }
  0x41   :  { %439 = vmatpush3.bf16.msra.mxu1 %v438_v1 }
  0x42   :  { %436 = vmatpush3.bf16.msra.mxu0 %v433_v7  ;;  %440 = vmatprep.subr.bf16.mxu1 %v588_v2  ;;  %v590_v7 = vmov 0.0   ;;  %p537_p13 = por %p536_p12, %p535_p11 }
  0x43   :  { %426 = vmatprep.mubr.msk.f32.mxu1 %vm589_vm2, %v590_v7 }
  0x44   :  { %p538_p0 = pnand %p537_p13, %p531_p10 }
  0x45   :  { %416 = vmatmul.mubr.msk.f32.vlgmr.msra.gmra.mrb[0].mxu0 %vm86_vm0, %v697_v8  ;;  %442 = vmatpush3.bf16.msra.mxu1 %v441_v5 }
 0x118   :  { %v417_v10 = vpop.f32.mrb[0].mxu0 }
 0x119   :  { %v159_v11 = vpop.f32.mrb[1].mxu0  ;;  %v165_v12 = vadd.f32 %v417_v10, %v389_v9 }
 0x11a   :  { %v160_v13 = vadd.f32 %v389_v9, %v159_v11  ;;  %v345_v9 = vlaneseq }
 0x11b   :  { %v169_v16 = vmax.f32 %v165_v12, 0.0 }
 0x11c   :  { %v168_v15 = vmax.f32 %v160_v13, 0.0  ;;  %v346_v10 = vand.u32 127, %v345_v9  ;;  %v348_v11 = vshrl.u32 %v345_v9, 7 }
 0x11d   :  { %v178_v18 = vmul.f32 %v392_v14, %v169_v16 }
 0x11e   :  { %v177_v17 = vmul.f32 %v392_v14, %v168_v15  ;;  %v349_v13 = vsub.s32 %v346_v10, %v348_v11 }
 0x120   :  { %179 = vadd.xlane.f32.xlu0 %v177_v17 }
 0x124   :  { %181 = vadd.xlane.f32.xlu0 %v178_v18 }
 0x1ad   :  { %v180_v21 = vpop.xlane.xlu0 %179 }
 0x1ae   :  { %v190_v22 = vadd.f32 %v393_v20, %v180_v21 }
 0x1b0   :  { %v193_v23 = vsel %vm192_vm1, %v190_v22, -inf }
 0x1b1   :  { %v194_v24 = vrot.slane %v193_v23, 4  ;;  %v182_v25 = vpop.xlane.xlu0 %181 }
 0x1b2   :  { %v191_v26 = vadd.f32 %v393_v20, %v182_v25 }
 0x1b3   :  { %v195_v27 = vmax.f32 %v193_v23, %v194_v24 }
 0x1b4   :  { %v200_v28 = vsel %vm192_vm1, %v191_v26, -inf }
 0x1b5   :  { %v196_v29 = vrot.slane %v195_v27, 2  ;;  %v201_v30 = vrot.slane %v200_v28, 4 }
 0x1b7   :  { %v197_v31 = vmax.f32 %v195_v27, %v196_v29  ;;  %v202_v32 = vmax.f32 %v200_v28, %v201_v30 }
 0x1b9   :  { %v198_v33 = vrot.slane %v197_v31, 1  ;;  %v203_v34 = vrot.slane %v202_v32, 2 }
 0x1bb   :  { %v199_v35 = vmax.f32 %v197_v31, %v198_v33  ;;  %v204_v36 = vmax.f32 %v202_v32, %v203_v34 }
 0x1bd   :  { %v207_v37 = vsub.f32 %v190_v22, %v199_v35  ;;  %v205_v38 = vrot.slane %v204_v36, 1 }
 0x1bf   :  { %v209_v39 = vmul.f32 1.442695, %v207_v37  ;;  %v206_v40 = vmax.f32 %v204_v36, %v205_v38 }
 0x1c1   :  { %456 = vpow2.f32 %v209_v39  ;;  %v208_v41 = vsub.f32 %v191_v26, %v206_v40 }
 0x1c3   :  { %v211_v42 = vmul.f32 1.442695, %v208_v41 }
 0x1c5   :  { %458 = vpow2.f32 %v211_v42 }
 0x1cb   :  { %v457_v43 = vpop.eup %456 }
 0x1cc   :  { %v213_v44 = vsel %vm192_vm1, %v457_v43, 0.0 }
 0x1cd   :  { %v214_v45 = vrot.slane %v213_v44, 4 }
 0x1cf   :  { %v459_v46 = vpop.eup %458  ;;  %v215_v47 = vadd.f32 %v214_v45, %v213_v44 }
 0x1d0   :  { %v220_v48 = vsel %vm192_vm1, %v459_v46, 0.0 }
 0x1d1   :  { %v216_v49 = vrot.slane %v215_v47, 2  ;;  %v221_v50 = vrot.slane %v220_v48, 4 }
 0x1d3   :  { %v217_v51 = vadd.f32 %v216_v49, %v215_v47  ;;  %v222_v52 = vadd.f32 %v221_v50, %v220_v48 }
 0x1d5   :  { %v223_v53 = vrot.slane %v222_v52, 2  ;;  %v218_v54 = vrot.slane %v217_v51, 1 }
 0x1d7   :  { %v219_v55 = vadd.f32 %v218_v54, %v217_v51  ;;  %v224_v56 = vadd.f32 %v223_v53, %v222_v52 }
 0x1d9   :  { %460 = vrcp.f32 %v219_v55  ;;  %v225_v57 = vrot.slane %v224_v56, 1 }
 0x1db   :  { %v226_v58 = vadd.f32 %v225_v57, %v224_v56 }
 0x1dd   :  { %462 = vrcp.f32 %v226_v58 }
 0x1e3   :  { %v461_v59 = vpop.eup %460 }
 0x1e4   :  { %v229_v60 = vmul.f32 %v461_v59, %v457_v43 }
 0x1e6   :  { %233 = vperm.xlu1 %454, %v229_v60  }
 0x1e7   :  { %v463_v61 = vpop.eup %462 }
 0x1e8   :  { %v230_v62 = vmul.f32 %v463_v61, %v459_v46 }
 0x1ea   :  { %238 = vperm.xlu1 %454, %v230_v62  }
 0x265   :  { %v234_v12 = vpop.permute.xlu1 %233 }
 0x266   :  { %v241_v14 = vmul.f32 %v234_v12, %v693_v6  ;;  %v350_v18 = vrot.slane %v234_v12, %v349_v13 }
 0x268   :  { %v243_v15 = vsel %vm86_vm0, %v241_v14, 0.0 }
 0x269   :  { %v244_v16 = vrot.slane %v243_v15, 4  ;;  %v239_v17 = vpop.permute.xlu1 %238 }
 0x26a   :  { %v242_v19 = vmul.f32 %v239_v17, %v697_v8  ;;  %v354_v20 = vrot.slane %v239_v17, %v349_v13 }
 0x26b   :  { %v245_v21 = vadd.f32 %v244_v16, %v243_v15 }
 0x26c   :  { %v250_v22 = vsel %vm86_vm0, %v242_v19, 0.0  ;;  %v355_v23 = vsel %vm270_vm3, %v354_v20, %v350_v18 }
 0x26d   :  { %v246_v24 = vrot.slane %v245_v21, 2  ;;  %v251_v25 = vrot.slane %v250_v22, 4  ;;  %358 = vst.msk [vmem:[#allocation10] sm:$0x3] %vm357_vm4, %v355_v23 }
 0x26f   :  { %v247_v26 = vadd.f32 %v246_v24, %v245_v21  ;;  %v252_v6 = vadd.f32 %v251_v25, %v250_v22 }
 0x271   :  { %v253_v27 = vrot.slane %v252_v6, 2  ;;  %v248_v28 = vrot.slane %v247_v26, 1 }
 0x273   :  { %v254_v29 = vadd.f32 %v253_v27, %v252_v6  ;;  %v249_v32 = vadd.f32 %v248_v28, %v247_v26 }
 0x275   :  { %v255_v30 = vrot.slane %v254_v29, 1 }
 0x277   :  { %v256_v31 = vadd.f32 %v255_v30, %v254_v29 }
 0x279   :  { %v271_v8 = vsel %vm270_vm3, %v256_v31, %v249_v32 }
 0x27a   :  { %427 = vmatmul.mubr.msk.f32.vlgmr.msra.gmra.mrb[0].mxu1 %vm86_vm0, %v271_v8 }
 0x27b   :  { %541 = shalt.err (!%p538_p0)
}
 0x27c   :  { %s542_s25 = scalar_lea.hbm %s753_s8, 32 }
 0x27d   :  { %p543_p1 = scmp.ne.s32.totalorder %s753_s8, %s542_s25  ;;  %p546_p2 = scmp.lt.u32.totalorder %s542_s25, %s753_s8 }
 0x27f   :  { %p548_p3 = pnand %p546_p2, %p543_p1 }
 0x281   :  { %551 = shalt.err (!%p548_p3)
}
 0x282   :  { %378 = dma.vmem_to_hbm [thread:$0]  %s376_s3, 32, %s753_s8, [#allocation11]   ;;  %v394_v33 = vld [vmem:[%s751_s6] ss:$0 sm:$0xff] }
 0x283   :  { %s592_s12 = smov [#allocation9]  }
 0x284   :  { %s365_s13 = sshll.u32 %s592_s12, 4  ;;  %s366_s13 = int_to_ptr.vmem [resolvable:$true] %s365_s13 }
 0x285   :  { %s552_s14 = scalar_lea.vmem %s366_s13, 32  ;;  %p557_p5 = scmp.lt.s32.totalorder %s366_s13, %s366_s13 }
 0x286   :  { %p553_p4 = scmp.ne.s32.totalorder %s366_s13, %s552_s14  ;;  %p558_p6 = scmp.lt.s32.totalorder %s552_s14, %s552_s14 }
 0x288   :  { %p559_p7 = por %p558_p6, %p557_p5 }
 0x28a   :  { %p560_p8 = pnand %p559_p7, %p553_p4 }
 0x34d   :  { %v340_v34 = vpop.f32.mrb[0].mxu1 }
 0x34e   :  { %v341_v35 = vadd.f32 %v394_v33, %v340_v34  ;;  %v428_v36 = vpop.f32.mrb[1].mxu1 }
 0x350   :  { %344 = vst [vmem:[#allocation9] sm:$0x3] %v341_v35 }
 0x351   :  { %563 = shalt.err (!%p560_p8)
}
 0x352   :  { %s564_s4 = scalar_lea.hbm %s752_s7, 32 }
 0x353   :  { %p565_p9 = scmp.ne.s32.totalorder %s752_s7, %s564_s4  ;;  %p568_p10 = scmp.lt.u32.totalorder %s564_s4, %s752_s7 }
 0x355   :  { %p570_p11 = pnand %p568_p10, %p565_p9 }
 0x357   :  { %573 = shalt.err (!%p570_p11)
}
 0x358   :  { %368 = dma.vmem_to_hbm [thread:$0]  %s366_s13, 32, %s752_s7, [#allocation5]  }
 0x359   :  { %578 = dma.done.wait [#allocation5], 32  }
 0x35a   :  { %579 = vsyncadd [#allocation5], 4294967264 }
 0x35b   :  { %580 = dma.done.wait [#allocation11], 32  }
 0x35c   :  { %581 = vsyncadd [#allocation11], 4294967264 }
 0x35d   :  { %385 = vsyncpa [#allocation4], 1 }
 0x35e   :  { %386 = vsyncpa [#allocation7], 1 }
 0x35f   :  { %387 = vsyncpa [#allocation5], 1 }
 0x360   :  { %388 = vsyncpa [#allocation11], 1 }

</bundles_post_ra>
